<compile_context>
chip_gen: v7x
topology: tpu7x:2x2x1
jax: 0.10.0
libtpu: 0.0.40
codegen_flags: <defaults>
</compile_context>

<pallas_src>
import functools
import math

import jax
import jax.numpy as jnp
from jax.experimental import pallas as pl
from jax.experimental.pallas import tpu as pltpu

LANE = 128
BN_EPS = 1e-5


def _round_up(x, m):
    return ((x + m - 1) // m) * m


def _pad_amounts(k, stride):
    # Matches the PyTorch module: padding = k - stride; if odd, ConstantPad2d
    # ((p%2, p-p%2, p%2, p-p%2)), else symmetric p//2.
    p = k - stride
    assert p >= 0, "ConvBlock padding assumes kernel_size >= stride"
    if p % 2 != 0:
        return p % 2, p - p % 2
    return p // 2, p // 2


# ------------------------------- Pallas kernel -------------------------------
def _conv_block_gemm_kernel(p_ref, w_ref, scale_ref, shift_ref, o_ref,
                            *, apply_relu):
    """One full-depth MXU matmul per row tile + fused BN/ReLU affine epilogue.

    p_ref:     (TM, Kp)  bf16  im2col patch rows (Kp = k*k*Cin padded to 128)
    w_ref:     (Kp, Np)  bf16  reshaped conv weights (Np = Cout padded to 128)
    scale_ref: (1, Np)   f32   folded BN scale (ones if BN disabled / preact)
    shift_ref: (1, Np)   f32   folded BN shift + conv bias
    o_ref:     (TM, Np)  bf16  lane-dense output rows
    """
    acc = jnp.dot(p_ref[...], w_ref[...], preferred_element_type=jnp.float32)
    y = acc * scale_ref[...] + shift_ref[...]
    if apply_relu:
        y = jnp.maximum(y, 0.0)
    o_ref[...] = y.astype(o_ref.dtype)


# --------------------------------- wrapper -----------------------------------
def conv_block_forward(x_nchw, params, *, kernel_size, stride=1,
                       batch_norm=True, preactivation=False):
    """ConvBlock forward (dim='2d'). I/O is NCHW f32 to match PyTorch."""
    k, s = kernel_size, stride
    x = jnp.transpose(x_nchw, (0, 2, 3, 1)).astype(jnp.float32)      # NCHW -> NHWC
    B, H, W, Cin = x.shape
    Cout = params["w"].shape[0]

    if preactivation:
        # BN + ReLU on the *unpadded* input, in XLA so they fuse with the pad
        # and im2col below (no extra pallas_call, math in f32).
        if batch_norm:
            bn = params["bn"]
            inv = jax.lax.rsqrt(bn["var"] + BN_EPS)
            x = (x - bn["mean"]) * (bn["gamma"] * inv) + bn["beta"]
        x = jnp.maximum(x, 0.0)

    lo, hi = _pad_amounts(k, s)
    xp = jnp.pad(x, ((0, 0), (lo, hi), (lo, hi), (0, 0))).astype(jnp.bfloat16)
    Hp, Wp = H + lo + hi, W + lo + hi
    Ho, Wo = (Hp - k) // s + 1, (Wp - k) // s + 1

    # im2col in XLA (bf16, lane-dense): k*k strided tap slices concatenated on
    # the channel axis; element order (i*k + j)*Cin + c matches OIHW weights.
    taps = []
    for i in range(k):
        for j in range(k):
            taps.append(xp[:, i:i + s * (Ho - 1) + 1:s,
                           j:j + s * (Wo - 1) + 1:s, :])
    patches = jnp.concatenate(taps, axis=-1)                 # (B, Ho, Wo, k*k*Cin)
    K = k * k * Cin
    # TODO(synk): pad the contraction to multiples of 256 on v6e/v7x once
    #             k*k*Cin grows past 128 (128-multiples are the v5e MXU depth).
    Kp = _round_up(K, LANE)
    Np = _round_up(Cout, LANE)

    rows = B * Ho * Wo
    if rows >= 1024:
        TM = 512
    elif rows >= 512:
        TM = 256          # >= 2 "parallel" grid steps -> both v7x TCs get work
    else:
        TM = _round_up(rows, 8)
    rows_pad = _round_up(rows, TM)

    patches = patches.reshape(rows, K)
    patches = jnp.pad(patches, ((0, rows_pad - rows), (0, Kp - K)))

    # Weights: PyTorch (Cout, Cin, kh, kw) -> (Kp, Np) bf16.
    w = jnp.transpose(params["w"], (2, 3, 1, 0)).reshape(K, Cout)
    w = jnp.pad(w, ((0, Kp - K), (0, Np - Cout))).astype(jnp.bfloat16)

    bias = params["b"].astype(jnp.float32)
    if (not preactivation) and batch_norm:
        # Fold eval-mode BN of the conv output into a per-channel affine.
        bn = params["bn"]
        inv = jax.lax.rsqrt(bn["var"] + BN_EPS)
        scale = bn["gamma"] * inv
        shift = bn["beta"] + (bias - bn["mean"]) * scale
    else:
        scale = jnp.ones((Cout,), jnp.float32)
        shift = bias
    scale = jnp.pad(scale, (0, Np - Cout)).reshape(1, Np)
    shift = jnp.pad(shift, (0, Np - Cout)).reshape(1, Np)

    kernel = functools.partial(_conv_block_gemm_kernel,
                               apply_relu=not preactivation)
    out = pl.pallas_call(
        kernel,
        out_shape=jax.ShapeDtypeStruct((rows_pad, Np), jnp.bfloat16),
        grid=(rows_pad // TM,),
        in_specs=[
            pl.BlockSpec((TM, Kp), lambda i: (i, 0)),
            pl.BlockSpec((Kp, Np), lambda i: (0, 0)),
            pl.BlockSpec((1, Np), lambda i: (0, 0)),
            pl.BlockSpec((1, Np), lambda i: (0, 0)),
        ],
        out_specs=pl.BlockSpec((TM, Np), lambda i: (i, 0)),
        compiler_params=pltpu.CompilerParams(
            dimension_semantics=("parallel",)),
    )(patches, w, scale, shift)

    # Kernel-native layout is lane-dense (rows_pad, Np) bf16; chained ConvBlocks
    # should consume that directly. Slice / reshape / cast back to NCHW f32 only
    # for API parity with the PyTorch module.
    out = out[:rows, :Cout].astype(jnp.float32).reshape(B, Ho, Wo, Cout)
    return jnp.transpose(out, (0, 3, 1, 2))                          # NHWC -> NCHW


# --------------------------- pure-XLA reference ------------------------------
def conv_block_reference(x_nchw, params, *, kernel_size, stride=1,
                         batch_norm=True, preactivation=False):
    k, s = kernel_size, stride
    x = x_nchw.astype(jnp.float32)

    def bn_apply(t, bn):
        shp = (1, -1, 1, 1)
        inv = jax.lax.rsqrt(bn["var"] + BN_EPS)
        return ((t - bn["mean"].reshape(shp)) * (bn["gamma"] * inv).reshape(shp)
                + bn["beta"].reshape(shp))

    if preactivation:
        if batch_norm:
            x = bn_apply(x, params["bn"])
        x = jnp.maximum(x, 0.0)
    lo, hi = _pad_amounts(k, s)
    xp = jnp.pad(x, ((0, 0), (0, 0), (lo, hi), (lo, hi)))
    y = jax.lax.conv_general_dilated(
        xp, params["w"], (s, s), "VALID",
        dimension_numbers=("NCHW", "OIHW", "NCHW"))
    y = y + params["b"].reshape(1, -1, 1, 1)
    if not preactivation:
        if batch_norm:
            y = bn_apply(y, params["bn"])
        y = jnp.maximum(y, 0.0)
    return y


# ------------------------------ parameter init -------------------------------
def init_conv_block(key, in_ch, out_ch, k, *, batch_norm=True, preactivation=False):
    ks = jax.random.split(key, 6)
    fan = in_ch * k * k
    p = dict(
        w=jax.random.normal(ks[0], (out_ch, in_ch, k, k), jnp.float32)
        / math.sqrt(fan),
        b=0.05 * jax.random.normal(ks[1], (out_ch,), jnp.float32),
    )
    if batch_norm:
        c = in_ch if preactivation else out_ch
        p["bn"] = dict(
            gamma=1.0 + 0.1 * jax.random.normal(ks[2], (c,), jnp.float32),
            beta=0.05 * jax.random.normal(ks[3], (c,), jnp.float32),
            mean=0.1 * jax.random.normal(ks[4], (c,), jnp.float32),
            var=0.5 + jax.random.uniform(ks[5], (c,), jnp.float32),
        )
    return p


# ----------------------------------- main ------------------------------------
if __name__ == "__main__":
    root = jax.random.PRNGKey(0)
    kx, kp1, kp2 = jax.random.split(root, 3)
    x = jax.random.normal(kx, (2, 4, 16, 16), jnp.float32)

    configs = [
        # (out_ch, kernel_size, stride, batch_norm, preactivation)
        (32, 3, 1, True, False),   # default ConvBlock: pad -> conv -> BN -> ReLU
        (24, 5, 2, True, True),    # preactivation + strided (asymmetric pad) path
    ]
    for pkey, (out_ch, k, s, bn, pre) in zip((kp1, kp2), configs):
        params = init_conv_block(pkey, 4, out_ch, k,
                                 batch_norm=bn, preactivation=pre)
        fwd = jax.jit(functools.partial(conv_block_forward, kernel_size=k,
                                        stride=s, batch_norm=bn,
                                        preactivation=pre))
        out = jax.block_until_ready(fwd(x, params))
        ref = conv_block_reference(x, params, kernel_size=k, stride=s,
                                   batch_norm=bn, preactivation=pre)
        assert out.shape == ref.shape, (out.shape, ref.shape)
        assert bool(jnp.all(jnp.isfinite(out)))
        # bf16 MXU operands + bf16 output storage vs f32 ref -> loose tolerance.
        assert bool(jnp.allclose(out, ref, atol=5e-2, rtol=5e-2)), float(
            jnp.max(jnp.abs(out - ref)))
    print("KERNEL_OK")
</pallas_src>

<mosaic_0001>
module attributes {stable_mosaic.version = 11 : i64} {
  func.func @_conv_block_gemm_kernel(%arg0: i32, %arg1: memref<256x128xbf16, #tpu.memory_space<vmem>>, %arg2: memref<128x128xbf16, #tpu.memory_space<vmem>>, %arg3: memref<1x128xf32, #tpu.memory_space<vmem>>, %arg4: memref<1x128xf32, #tpu.memory_space<vmem>>, %arg5: memref<256x128xbf16, #tpu.memory_space<vmem>>) attributes {dimension_semantics = [#tpu.dimension_semantics<parallel>], iteration_bounds = array<i64: 2>, scalar_prefetch = 0 : i64, scratch_operands = 0 : i64, tpu.core_type = #tpu.core_type<tc>, window_params = [{transform_indices = @transform_0, window_bounds = array<i64: 256, 128>}, {pipeline_mode = #tpu.pipeline_mode<synchronous>, transform_indices = @transform_1, window_bounds = array<i64: 128, 128>}, {pipeline_mode = #tpu.pipeline_mode<synchronous>, transform_indices = @transform_2, window_bounds = array<i64: 1, 128>}, {pipeline_mode = #tpu.pipeline_mode<synchronous>, transform_indices = @transform_3, window_bounds = array<i64: 1, 128>}, {transform_indices = @transform_4, window_bounds = array<i64: 256, 128>}]} {
    %c0 = arith.constant 0 : index
    %c0_0 = arith.constant 0 : index
    %0 = vector.load %arg1[%c0, %c0_0] : memref<256x128xbf16, #tpu.memory_space<vmem>>, vector<256x128xbf16>
    %c0_1 = arith.constant 0 : index
    %c0_2 = arith.constant 0 : index
    %1 = vector.load %arg2[%c0_1, %c0_2] : memref<128x128xbf16, #tpu.memory_space<vmem>>, vector<128x128xbf16>
    %cst = arith.constant dense<0.000000e+00> : vector<256x128xf32>
    %2 = tpu.matmul %0, %1, %cst {dimension_numbers = #tpu.dot_dimension_numbers<[1], [0], [0], [1], [0, 0, 1, 1], [], []>} : vector<256x128xbf16>, vector<128x128xbf16>, vector<256x128xf32> -> vector<256x128xf32>
    %c0_3 = arith.constant 0 : index
    %c0_4 = arith.constant 0 : index
    %3 = vector.load %arg3[%c0_3, %c0_4] : memref<1x128xf32, #tpu.memory_space<vmem>>, vector<1x128xf32>
    %4 = vector.broadcast %3 : vector<1x128xf32> to vector<256x128xf32>
    %5 = arith.mulf %2, %4 : vector<256x128xf32>
    %c0_5 = arith.constant 0 : index
    %c0_6 = arith.constant 0 : index
    %6 = vector.load %arg4[%c0_5, %c0_6] : memref<1x128xf32, #tpu.memory_space<vmem>>, vector<1x128xf32>
    %7 = vector.broadcast %6 : vector<1x128xf32> to vector<256x128xf32>
    %8 = arith.addf %5, %7 : vector<256x128xf32>
    %cst_7 = arith.constant 0.000000e+00 : f32
    %9 = vector.broadcast %cst_7 : f32 to vector<256x128xf32>
    %10 = arith.maximumf %8, %9 : vector<256x128xf32>
    %11 = arith.truncf %10 : vector<256x128xf32> to vector<256x128xbf16>
    %c0_8 = arith.constant 0 : index
    %c0_9 = arith.constant 0 : index
    %12 = vector.load %arg5[%c0_8, %c0_9] : memref<256x128xbf16, #tpu.memory_space<vmem>>, vector<256x128xbf16>
    tpu.vector_store %arg5[%c0_8, %c0_9], %11 {strides = array<i32>} : memref<256x128xbf16, #tpu.memory_space<vmem>>, vector<256x128xbf16>,
    return
  }
  func.func @transform_0(%arg0: i32) -> (i32, i32) {
    %c0_i32 = arith.constant 0 : i32
    %c0_i32_0 = arith.constant 0 : i32
    return %arg0, %c0_i32 : i32, i32
  }
  func.func @transform_1(%arg0: i32) -> (i32, i32) {
    %c0_i32 = arith.constant 0 : i32
    %c0_i32_0 = arith.constant 0 : i32
    %c0_i32_1 = arith.constant 0 : i32
    return %c0_i32, %c0_i32_0 : i32, i32
  }
  func.func @transform_2(%arg0: i32) -> (i32, i32) {
    %c0_i32 = arith.constant 0 : i32
    %c0_i32_0 = arith.constant 0 : i32
    %c0_i32_1 = arith.constant 0 : i32
    return %c0_i32, %c0_i32_0 : i32, i32
  }
  func.func @transform_3(%arg0: i32) -> (i32, i32) {
    %c0_i32 = arith.constant 0 : i32
    %c0_i32_0 = arith.constant 0 : i32
    %c0_i32_1 = arith.constant 0 : i32
    return %c0_i32, %c0_i32_0 : i32, i32
  }
  func.func @transform_4(%arg0: i32) -> (i32, i32) {
    %c0_i32 = arith.constant 0 : i32
    %c0_i32_0 = arith.constant 0 : i32
    return %arg0, %c0_i32 : i32, i32
  }
}

</mosaic_0001>

<bundles_post_ra>
// kernel: conv_block_forward.1
= control target key start
LH: loop header
LB: loop body
LE: loop exit
PB: predicated region body
PF: predicated region fallthrough
CT: control target
= control target key end

     0   :  { %s1230_s15 = smov 0   ;;  %s1388_s0 = inlined_call_operand.vmem [shape: bf16[512,128], index: 0, kind: input, shape index: {}]   ;;  %s1389_s1 = inlined_call_operand.vmem [shape: bf16[128,128], index: 1, kind: input, shape index: {}]   ;;  %s1390_s2 = inlined_call_operand.vmem [shape: f32[1,128], index: 2, kind: input, shape index: {}]   ;;  %s1391_s3 = inlined_call_operand.vmem [shape: f32[1,128], index: 3, kind: input, shape index: {}]   ;;  %s1392_s4 = inlined_call_operand.vmem [shape: bf16[512,128], index: 4, kind: output, shape index: {}]  }
   0x1 LB: > { %s881_s16 = sadd.s32 4294967295, %s1203_s15   ;;  %p885_p0 = scmp.ge.s32.totalorder %s1203_s15, 1  ;;  %s1203_s15 = sphi %s1230_s15, %s14_s15  }
   0x2   : > { %p163_p1 = scmp.lt.s32.totalorder %s1203_s15, 3 }
   0x4   : > { %p164_p2 = pnand %p885_p0, %p163_p1 }
   0x5   : > { %v1173_v0 = vld [vmem:[%s1389_s1] sm:$0xff] (!%p164_p2)   ;;  %s886_s19 = sshll.u32 (!%p164_p2), %s881_s16, 5  ;;  %v1174_v1 = vld [vmem:[%s1389_s1 + $0x8] sm:$0xff] (!%p164_p2)   ;;  %v1175_v2 = vld [vmem:[%s1389_s1 + $0x10] sm:$0xff] (!%p164_p2)  }
   0x6   : > { %167 = sbr.rel (%p164_p2) target bundleno = 287 (0x11f), region = 36  ;;  %p190_p3 = scmp.lt.s32.totalorder (!%p164_p2), %s886_s19, 63  ;;  %1101 = vmatprep.subr.bf16.mxu0 (!%p164_p2), %v1173_v0  ;;  %1149 = vmatprep.subr.bf16.mxu1 (!%p164_p2), %v1173_v0  ;;  %v1176_v3 = vld [vmem:[%s1389_s1 + $0x18] sm:$0xff] (!%p164_p2)   ;;  %v1177_v6 = vld [vmem:[%s1389_s1 + $0x20] sm:$0xff] (!%p164_p2)   ;;  %v1178_v7 = vld [vmem:[%s1389_s1 + $0x28] sm:$0xff] (!%p164_p2)  }
   0x7   : > { %1102 = vmatpush3.bf16.msra.mxu0 (!%p164_p2), %v1173_v0  ;;  %1157 = vmatpush3.bf16.msra.mxu1 (!%p164_p2), %v1173_v0  ;;  %v1179_v8 = vld [vmem:[%s1389_s1 + $0x30] sm:$0xff] (!%p164_p2)   ;;  %v1180_v9 = vld [vmem:[%s1389_s1 + $0x38] sm:$0xff] (!%p164_p2)   ;;  %v1291_v24 = vld [vmem:[%s1390_s2] ss:$0 sm:$0xff] (!%p164_p2) }
   0x8   : > { %1103 = vmatprep.subr.bf16.mxu0 (!%p164_p2), %v1174_v1  ;;  %1150 = vmatprep.subr.bf16.mxu1 (!%p164_p2), %v1174_v1  ;;  %v1296_v26 = vld [vmem:[%s1391_s3] ss:$0 sm:$0xff] (!%p164_p2) }
   0xb   : > { %1104 = vmatpush3.bf16.msra.mxu0 (!%p164_p2), %v1174_v1  ;;  %1158 = vmatpush3.bf16.msra.mxu1 (!%p164_p2), %v1174_v1 }
   0xc   : > { %1105 = vmatprep.subr.bf16.mxu0 (!%p164_p2), %v1175_v2  ;;  %1151 = vmatprep.subr.bf16.mxu1 (!%p164_p2), %v1175_v2 }
   0xd   : > { %s1394_s19 = smov (!%p190_p3, %s886_s19), 63 }
   0xe   : > { %s887_s24 = sshll.u32 %s1394_s19, 2 }
   0xf   : > { %s1255_s27 = scalar_lea.vmem %s1388_s0, %s887_s24  ;;  %1106 = vmatpush3.bf16.msra.mxu0 %v1175_v2  ;;  %1159 = vmatpush3.bf16.msra.mxu1 %v1175_v2  ;;  %s1319_s20 = scalar_lea.vmem %s1392_s4, %s887_s24 }
  0x10   : > { %v1181_v4 = vld [vmem:[%s1255_s27] sm:$0xff]   ;;  %1107 = vmatprep.subr.bf16.mxu0 %v1176_v3  ;;  %1152 = vmatprep.subr.bf16.mxu1 %v1176_v3  ;;  %v1183_v10 = vld [vmem:[%s1255_s27 + $0x8] sm:$0xff]   ;;  %v1185_v12 = vld [vmem:[%s1255_s27 + $0x10] sm:$0xff]  }
  0x11   : > { %v1182_v5 = vld [vmem:[%s1255_s27 + $0x40] sm:$0xff]   ;;  %1117 = vmatprep.mubr.bf16.mxu0 %v1181_v4  ;;  %v1184_v11 = vld [vmem:[%s1255_s27 + $0x48] sm:$0xff]   ;;  %v1186_v13 = vld [vmem:[%s1255_s27 + $0x50] sm:$0xff]  }
  0x12   : > { %1133 = vmatprep.mubr.bf16.mxu1 %v1182_v5  ;;  %v1187_v14 = vld [vmem:[%s1255_s27 + $0x18] sm:$0xff]   ;;  %v1189_v16 = vld [vmem:[%s1255_s27 + $0x20] sm:$0xff]   ;;  %v1191_v18 = vld [vmem:[%s1255_s27 + $0x28] sm:$0xff]  }
  0x13   : > { %1108 = vmatpush3.bf16.msra.mxu0 %v1176_v3  ;;  %1160 = vmatpush3.bf16.msra.mxu1 %v1176_v3  ;;  %v1188_v15 = vld [vmem:[%s1255_s27 + $0x58] sm:$0xff]   ;;  %v1190_v17 = vld [vmem:[%s1255_s27 + $0x60] sm:$0xff]   ;;  %v1192_v19 = vld [vmem:[%s1255_s27 + $0x68] sm:$0xff]  }
  0x14   : > { %1109 = vmatprep.subr.bf16.mxu0 %v1177_v6  ;;  %1153 = vmatprep.subr.bf16.mxu1 %v1177_v6  ;;  %v1193_v20 = vld [vmem:[%s1255_s27 + $0x30] sm:$0xff]   ;;  %v1195_v22 = vld [vmem:[%s1255_s27 + $0x38] sm:$0xff]  }
  0x15   : > { %v1194_v21 = vld [vmem:[%s1255_s27 + $0x70] sm:$0xff]   ;;  %v1196_v23 = vld [vmem:[%s1255_s27 + $0x78] sm:$0xff]  }
  0x17   : > { %1110 = vmatpush3.bf16.msra.mxu0 %v1177_v6  ;;  %1161 = vmatpush3.bf16.msra.mxu1 %v1177_v6 }
  0x18   : > { %1111 = vmatprep.subr.bf16.mxu0 %v1178_v7  ;;  %1154 = vmatprep.subr.bf16.mxu1 %v1178_v7 }
  0x1b   : > { %1112 = vmatpush3.bf16.msra.mxu0 %v1178_v7  ;;  %1162 = vmatpush3.bf16.msra.mxu1 %v1178_v7 }
  0x1c   : > { %1113 = vmatprep.subr.bf16.mxu0 %v1179_v8  ;;  %1155 = vmatprep.subr.bf16.mxu1 %v1179_v8 }
  0x1f   : > { %1114 = vmatpush3.bf16.msra.mxu0 %v1179_v8  ;;  %1163 = vmatpush3.bf16.msra.mxu1 %v1179_v8 }
  0x20   : > { %1115 = vmatprep.subr.bf16.mxu0 %v1180_v9  ;;  %1156 = vmatprep.subr.bf16.mxu1 %v1180_v9 }
  0x23   : > { %1116 = vmatpush3.bf16.msra.mxu0 %v1180_v9  ;;  %1164 = vmatpush3.bf16.msra.mxu1 %v1180_v9 }
  0x26   : > { %1118 = vmatmul.mubr.bf16.vlgmr.msra.gmra.mrb[0].mxu0 %v1183_v10  ;;  %1134 = vmatmul.mubr.bf16.vlgmr.msra.gmra.mrb[0].mxu1 %v1184_v11 }
  0x27   : > { %1121 = vmatprep.mubr.bf16.mxu0 %v1185_v12  ;;  %1137 = vmatprep.mubr.bf16.mxu1 %v1186_v13 }
  0x2e   : > { %1122 = vmatmul.mubr.bf16.gmra.mrb[4].mxu0 %v1187_v14  ;;  %1138 = vmatmul.mubr.bf16.gmra.mrb[4].mxu1 %v1188_v15 }
  0x2f   : > { %1125 = vmatprep.mubr.bf16.mxu0 %v1189_v16  ;;  %1141 = vmatprep.mubr.bf16.mxu1 %v1190_v17 }
  0x36   : > { %1126 = vmatmul.mubr.bf16.gmra.mrb[8].mxu0 %v1191_v18  ;;  %1142 = vmatmul.mubr.bf16.gmra.mrb[8].mxu1 %v1192_v19 }
  0x37   : > { %1129 = vmatprep.mubr.bf16.mxu0 %v1193_v20  ;;  %1145 = vmatprep.mubr.bf16.mxu1 %v1194_v21 }
  0x3e   : > { %1130 = vmatmul.mubr.bf16.gmra.mrb[12].mxu0 %v1195_v22  ;;  %1146 = vmatmul.mubr.bf16.gmra.mrb[12].mxu1 %v1196_v23 }
  0xf9   : > { %v1119_v25 = vpop.f32.mrb[0].mxu0  ;;  %v1135_v27 = vpop.f32.mrb[0].mxu1 }
  0xfa   : > { %v564_v28 = vmul.f32 %v1119_v25, %v1291_v24  ;;  %v580_v29 = vmul.f32 %v1135_v27, %v1291_v24  ;;  %v428_v30 = vpop.f32.mrb[1].mxu0  ;;  %v492_v31 = vpop.f32.mrb[1].mxu1 }
  0xfb   : > { %v562_v32 = vmul.f32 %v1291_v24, %v428_v30  ;;  %v578_v33 = vmul.f32 %v1291_v24, %v492_v31  ;;  %v1120_v34 = vpop.f32.mrb[2].mxu0  ;;  %v1136_v35 = vpop.f32.mrb[2].mxu1 }
  0xfc   : > { %v603_v36 = vadd.f32 %v1296_v26, %v564_v28  ;;  %v619_v37 = vadd.f32 %v1296_v26, %v580_v29  ;;  %v565_v38 = vmul.f32 %v1120_v34, %v1291_v24  ;;  %v581_v39 = vmul.f32 %v1136_v35, %v1291_v24  ;;  %v431_v40 = vpop.f32.mrb[3].mxu0  ;;  %v495_v41 = vpop.f32.mrb[3].mxu1 }
  0xfd   : > { %v601_v42 = vadd.f32 %v1296_v26, %v562_v32  ;;  %v617_v43 = vadd.f32 %v1296_v26, %v578_v33  ;;  %v563_v44 = vmul.f32 %v1291_v24, %v431_v40  ;;  %v579_v45 = vmul.f32 %v1291_v24, %v495_v41 }
  0xfe   : > { %v604_v46 = vadd.f32 %v1296_v26, %v565_v38  ;;  %v620_v47 = vadd.f32 %v1296_v26, %v581_v39  ;;  %v635_v50 = vmax.f32 %v603_v36, 0.0  ;;  %v651_v51 = vmax.f32 %v619_v37, 0.0 }
  0xff   : > { %v602_v48 = vadd.f32 %v1296_v26, %v563_v44  ;;  %v618_v49 = vadd.f32 %v1296_v26, %v579_v45  ;;  %v633_v54 = vmax.f32 %v601_v42, 0.0  ;;  %v649_v55 = vmax.f32 %v617_v43, 0.0 }
 0x100   : > { %v636_v52 = vmax.f32 %v604_v46, 0.0  ;;  %v652_v53 = vmax.f32 %v620_v47, 0.0 }
 0x101   : > { %v634_v56 = vmax.f32 %v602_v48, 0.0  ;;  %v650_v57 = vmax.f32 %v618_v49, 0.0  ;;  %v1123_v58 = vpop.f32.mrb[4].mxu0  ;;  %v1139_v59 = vpop.f32.mrb[4].mxu1 }
 0x102   : > { %v990_v60 = vpack.c.bf16 %v636_v52, %v635_v50  ;;  %v1030_v61 = vpack.c.bf16 %v652_v53, %v651_v51  ;;  %v568_v62 = vmul.f32 %v1123_v58, %v1291_v24  ;;  %v584_v63 = vmul.f32 %v1139_v59, %v1291_v24  ;;  %v444_v0 = vpop.f32.mrb[5].mxu0  ;;  %v508_v1 = vpop.f32.mrb[5].mxu1 }
 0x103   : > { %v985_v2 = vpack.c.bf16 %v634_v56, %v633_v54  ;;  %v1025_v3 = vpack.c.bf16 %v650_v57, %v649_v55  ;;  %v566_v4 = vmul.f32 %v1291_v24, %v444_v0  ;;  %v582_v5 = vmul.f32 %v1291_v24, %v508_v1  ;;  %v1124_v6 = vpop.f32.mrb[6].mxu0  ;;  %v1140_v7 = vpop.f32.mrb[6].mxu1 }
 0x104   : > { %1062 = vst [vmem:[%s1319_s20 + $0x8] sm:$0xff] %v990_v60   ;;  %1070 = vst [vmem:[%s1319_s20 + $0x48] sm:$0xff] %v1030_v61   ;;  %v607_v8 = vadd.f32 %v1296_v26, %v568_v62  ;;  %v623_v9 = vadd.f32 %v1296_v26, %v584_v63  ;;  %v569_v10 = vmul.f32 %v1124_v6, %v1291_v24  ;;  %v447_v12 = vpop.f32.mrb[7].mxu0  ;;  %v511_v13 = vpop.f32.mrb[7].mxu1 }
 0x105   : > { %v585_v11 = vmul.f32 %v1140_v7, %v1291_v24  ;;  %986 = vst [vmem:[%s1319_s20] sm:$0xff] %v985_v2   ;;  %1069 = vst [vmem:[%s1319_s20 + $0x40] sm:$0xff] %v1025_v3   ;;  %v605_v14 = vadd.f32 %v1296_v26, %v566_v4  ;;  %v621_v15 = vadd.f32 %v1296_v26, %v582_v5 }
 0x106   : > { %v567_v16 = vmul.f32 %v1291_v24, %v447_v12  ;;  %v583_v17 = vmul.f32 %v1291_v24, %v511_v13  ;;  %v608_v18 = vadd.f32 %v1296_v26, %v569_v10  ;;  %v639_v22 = vmax.f32 %v607_v8, 0.0 }
 0x107   : > { %v624_v19 = vadd.f32 %v1296_v26, %v585_v11  ;;  %v655_v23 = vmax.f32 %v623_v9, 0.0  ;;  %v637_v28 = vmax.f32 %v605_v14, 0.0  ;;  %v653_v29 = vmax.f32 %v621_v15, 0.0 }
 0x108   : > { %v606_v20 = vadd.f32 %v1296_v26, %v567_v16  ;;  %v622_v21 = vadd.f32 %v1296_v26, %v583_v17  ;;  %v640_v25 = vmax.f32 %v608_v18, 0.0 }
 0x109   : > { %v656_v27 = vmax.f32 %v624_v19, 0.0  ;;  %v1127_v32 = vpop.f32.mrb[8].mxu0  ;;  %v1143_v33 = vpop.f32.mrb[8].mxu1 }
 0x10a   : > { %v638_v30 = vmax.f32 %v606_v20, 0.0  ;;  %v654_v31 = vmax.f32 %v622_v21, 0.0  ;;  %v1000_v34 = vpack.c.bf16 %v640_v25, %v639_v22  ;;  %v572_v36 = vmul.f32 %v1127_v32, %v1291_v24  ;;  %v460_v38 = vpop.f32.mrb[9].mxu0  ;;  %v524_v39 = vpop.f32.mrb[9].mxu1 }
 0x10b   : > { %v1040_v35 = vpack.c.bf16 %v656_v27, %v655_v23  ;;  %v588_v37 = vmul.f32 %v1143_v33, %v1291_v24  ;;  %v570_v42 = vmul.f32 %v1291_v24, %v460_v38  ;;  %v586_v43 = vmul.f32 %v1291_v24, %v524_v39  ;;  %v1128_v44 = vpop.f32.mrb[10].mxu0  ;;  %v1144_v45 = vpop.f32.mrb[10].mxu1 }
 0x10c   : > { %v995_v40 = vpack.c.bf16 %v638_v30, %v637_v28  ;;  %v1035_v41 = vpack.c.bf16 %v654_v31, %v653_v29  ;;  %1064 = vst [vmem:[%s1319_s20 + $0x18] sm:$0xff] %v1000_v34   ;;  %v611_v46 = vadd.f32 %v1296_v26, %v572_v36  ;;  %v573_v48 = vmul.f32 %v1128_v44, %v1291_v24  ;;  %v463_v50 = vpop.f32.mrb[11].mxu0  ;;  %v527_v51 = vpop.f32.mrb[11].mxu1 }
 0x10d   : > { %1072 = vst [vmem:[%s1319_s20 + $0x58] sm:$0xff] %v1040_v35   ;;  %v627_v47 = vadd.f32 %v1296_v26, %v588_v37  ;;  %v589_v49 = vmul.f32 %v1144_v45, %v1291_v24  ;;  %v609_v52 = vadd.f32 %v1296_v26, %v570_v42  ;;  %v625_v53 = vadd.f32 %v1296_v26, %v586_v43 }
 0x10e   : > { %1063 = vst [vmem:[%s1319_s20 + $0x10] sm:$0xff] %v995_v40   ;;  %1071 = vst [vmem:[%s1319_s20 + $0x50] sm:$0xff] %v1035_v41   ;;  %v571_v54 = vmul.f32 %v1291_v24, %v463_v50  ;;  %v587_v55 = vmul.f32 %v1291_v24, %v527_v51  ;;  %v612_v56 = vadd.f32 %v1296_v26, %v573_v48  ;;  %v643_v60 = vmax.f32 %v611_v46, 0.0 }
 0x10f   : > { %v628_v57 = vadd.f32 %v1296_v26, %v589_v49  ;;  %v659_v61 = vmax.f32 %v627_v47, 0.0  ;;  %v641_v0 = vmax.f32 %v609_v52, 0.0  ;;  %v657_v1 = vmax.f32 %v625_v53, 0.0 }
 0x110   : > { %v610_v58 = vadd.f32 %v1296_v26, %v571_v54  ;;  %v626_v59 = vadd.f32 %v1296_v26, %v587_v55  ;;  %v644_v62 = vmax.f32 %v612_v56, 0.0 }
 0x111   : > { %v660_v63 = vmax.f32 %v628_v57, 0.0  ;;  %v1131_v4 = vpop.f32.mrb[12].mxu0  ;;  %v1147_v5 = vpop.f32.mrb[12].mxu1 }
 0x112   : > { %v642_v2 = vmax.f32 %v610_v58, 0.0  ;;  %v658_v3 = vmax.f32 %v626_v59, 0.0  ;;  %v1010_v6 = vpack.c.bf16 %v644_v62, %v643_v60  ;;  %v576_v8 = vmul.f32 %v1131_v4, %v1291_v24  ;;  %v476_v10 = vpop.f32.mrb[13].mxu0  ;;  %v540_v11 = vpop.f32.mrb[13].mxu1 }
 0x113   : > { %v1050_v7 = vpack.c.bf16 %v660_v63, %v659_v61  ;;  %v592_v9 = vmul.f32 %v1147_v5, %v1291_v24  ;;  %v574_v14 = vmul.f32 %v1291_v24, %v476_v10  ;;  %v590_v15 = vmul.f32 %v1291_v24, %v540_v11  ;;  %v1132_v16 = vpop.f32.mrb[14].mxu0  ;;  %v1148_v17 = vpop.f32.mrb[14].mxu1 }
 0x114   : > { %v1005_v12 = vpack.c.bf16 %v642_v2, %v641_v0  ;;  %v1045_v13 = vpack.c.bf16 %v658_v3, %v657_v1  ;;  %1066 = vst [vmem:[%s1319_s20 + $0x28] sm:$0xff] %v1010_v6   ;;  %v615_v18 = vadd.f32 %v1296_v26, %v576_v8  ;;  %v577_v20 = vmul.f32 %v1132_v16, %v1291_v24  ;;  %v479_v22 = vpop.f32.mrb[15].mxu0  ;;  %v543_v23 = vpop.f32.mrb[15].mxu1 }
 0x115   : > { %1074 = vst [vmem:[%s1319_s20 + $0x68] sm:$0xff] %v1050_v7   ;;  %v631_v19 = vadd.f32 %v1296_v26, %v592_v9  ;;  %v593_v21 = vmul.f32 %v1148_v17, %v1291_v24  ;;  %v613_v25 = vadd.f32 %v1296_v26, %v574_v14  ;;  %v629_v27 = vadd.f32 %v1296_v26, %v590_v15 }
 0x116   : > { %1065 = vst [vmem:[%s1319_s20 + $0x20] sm:$0xff] %v1005_v12   ;;  %1073 = vst [vmem:[%s1319_s20 + $0x60] sm:$0xff] %v1045_v13   ;;  %v575_v28 = vmul.f32 %v1291_v24, %v479_v22  ;;  %v591_v29 = vmul.f32 %v1291_v24, %v543_v23  ;;  %v616_v30 = vadd.f32 %v1296_v26, %v577_v20  ;;  %v647_v34 = vmax.f32 %v615_v18, 0.0 }
 0x117   : > { %v632_v31 = vadd.f32 %v1296_v26, %v593_v21  ;;  %v663_v35 = vmax.f32 %v631_v19, 0.0  ;;  %v645_v38 = vmax.f32 %v613_v25, 0.0  ;;  %v661_v39 = vmax.f32 %v629_v27, 0.0 }
 0x118   : > { %v614_v32 = vadd.f32 %v1296_v26, %v575_v28  ;;  %v630_v33 = vadd.f32 %v1296_v26, %v591_v29  ;;  %v648_v36 = vmax.f32 %v616_v30, 0.0 }
 0x119   : > { %v664_v37 = vmax.f32 %v632_v31, 0.0 }
 0x11a   : > { %v646_v40 = vmax.f32 %v614_v32, 0.0  ;;  %v662_v24 = vmax.f32 %v630_v33, 0.0  ;;  %v1020_v41 = vpack.c.bf16 %v648_v36, %v647_v34 }
 0x11b   : > { %v1060_v42 = vpack.c.bf16 %v664_v37, %v663_v35 }
 0x11c   : > { %v1015_v43 = vpack.c.bf16 %v646_v40, %v645_v38  ;;  %v1055_v44 = vpack.c.bf16 %v662_v24, %v661_v39  ;;  %1068 = vst [vmem:[%s1319_s20 + $0x38] sm:$0xff] %v1020_v41  }
 0x11d   : > { %1076 = vst [vmem:[%s1319_s20 + $0x78] sm:$0xff] %v1060_v42  }
 0x11e   : > { %1067 = vst [vmem:[%s1319_s20 + $0x30] sm:$0xff] %v1015_v43   ;;  %1075 = vst [vmem:[%s1319_s20 + $0x70] sm:$0xff] %v1055_v44  }
 0x11f PF: > { %s14_s15 = sadd.s32 1, %s1203_s15  }
 0x120   : > { %p11_p4 = scmp.ge.s32.totalorder %s14_s15, 4  }
 0x122   :  { %13 = sbr.rel (!%p11_p4) target bundleno = 1 (0x1), region = 66 }

</bundles_post_ra>
